<compile_context>
chip_gen: v7x
topology: tpu7x:2x2x1
jax: 0.10.0
libtpu: 0.0.40
codegen_flags: <defaults>
</compile_context>

<pallas_src>
import functools

import jax
import jax.numpy as jnp
from jax.experimental import pallas as pl
from jax.experimental.pallas import tpu as pltpu

# ----------------------------- ChatGLM-like config (TPU-friendly small) ------
NUM_HEADS = 4                      # config.num_attention_heads
HEAD_DIM = 128                     # config.hidden_size // num_attention_heads
HIDDEN = NUM_HEADS * HEAD_DIM      # 512
NUM_KV_HEADS = 2                   # config.multi_query_group_num (MQA)
KV_REP = NUM_HEADS // NUM_KV_HEADS
Q_SIZE = NUM_HEADS * HEAD_DIM      # 512
KV_SIZE = NUM_KV_HEADS * HEAD_DIM  # 256
QKV_OUT = Q_SIZE + 2 * KV_SIZE     # 1024
ROPE_WIDTH = Q_SIZE + KV_SIZE      # 768 (q and k get RoPE; v passes through)
ROTARY_DIM = HEAD_DIM // 2         # 64  (get_rope rotary_dim=head_dim//2)
ROPE_BASE = 10000.0                # 10000 * rope_ratio (rope_ratio = 1.0)
SCALE = HEAD_DIM ** -0.5
LANE = 128
TQ = 128                           # query-token tile
TK = 128                           # kv-token tile
SEQ_LEN = 256                      # test sequence length (2 x 2 grid)

# TODO(synk): vLLM paged KV-cache writeback / AttentionMetadata decode path and
# tensor-parallel collectives (QKVParallelLinear / RowParallelLinear) have no
# standalone Pallas equivalent here; this is the single-device prefill forward.


# ----------------------------- kernel 1: QKV projection + RoPE ---------------
def _qkv_rope_kernel(x_ref, w_ref, b_ref, cos_ref, ta_ref, tb_ref, o_ref):
    # qkv = x @ W + b   (bf16 inputs, f32 accumulate)
    qkv = jnp.dot(x_ref[...], w_ref[...],
                  preferred_element_type=jnp.float32) + b_ref[...]
    qk = qkv[:, :ROPE_WIDTH]          # q + k sections (lane-aligned views)
    v = qkv[:, ROPE_WIDTH:]           # v section, untouched by RoPE

    # Interleaved RoPE: out[2p]   = x[2p]*cos - x[2p+1]*sin
    #                   out[2p+1] = x[2p+1]*cos + x[2p]*sin
    # realised as  qk*cos + roll_a(qk)*ta + roll_b(qk)*tb  with per-128-lane
    # circular rotates (pair partners never cross a 128-lane head boundary,
    # and the coefficient tables are zero at the boundary lanes).
    roll_a, roll_b = [], []
    for c in range(ROPE_WIDTH // LANE):
        chunk = qk[:, c * LANE:(c + 1) * LANE]
        roll_a.append(pltpu.roll(chunk, LANE - 1, axis=1))
        roll_b.append(pltpu.roll(chunk, 1, axis=1))
    nb_a = jnp.concatenate(roll_a, axis=1)
    nb_b = jnp.concatenate(roll_b, axis=1)

    qk_roped = qk * cos_ref[...] + nb_a * ta_ref[...] + nb_b * tb_ref[...]
    o_ref[...] = jnp.concatenate([qk_roped, v], axis=1).astype(o_ref.dtype)


# ----------------- kernel 2: flash causal MQA + output dense projection ------
def _mqa_flash_dense_kernel(q_ref, k_ref, v_ref, wd_ref, o_ref,
                            m_ref, l_ref, acc_ref):
    i = pl.program_id(0)   # query-tile index   ("parallel")
    j = pl.program_id(1)   # kv-tile index      ("arbitrary", sequential)

    @pl.when(j == 0)
    def _init():
        m_ref[...] = jnp.full(m_ref.shape, -1e30, dtype=m_ref.dtype)
        l_ref[...] = jnp.zeros(l_ref.shape, l_ref.dtype)
        acc_ref[...] = jnp.zeros(acc_ref.shape, acc_ref.dtype)

    # Causality: only kv tiles j <= i contribute; skip fully-masked tiles.
    @pl.when(j <= i)
    def _compute():
        q_pos = i * TQ + jax.lax.broadcasted_iota(jnp.int32, (TQ, TK), 0)
        k_pos = j * TK + jax.lax.broadcasted_iota(jnp.int32, (TQ, TK), 1)
        causal = k_pos <= q_pos
        for h in range(NUM_HEADS):           # static unroll; 128-wide slices
            g = h // KV_REP                  # shared KV head (no repeat)
            qh = q_ref[:, h * HEAD_DIM:(h + 1) * HEAD_DIM]     # (TQ, D) bf16
            kh = k_ref[:, g * HEAD_DIM:(g + 1) * HEAD_DIM]     # (TK, D) bf16
            vh = v_ref[:, g * HEAD_DIM:(g + 1) * HEAD_DIM]     # (TK, D) bf16
            # scale already folded into q via the RoPE tables
            s = jax.lax.dot_general(
                qh, kh, (((1,), (1,)), ((), ())),
                preferred_element_type=jnp.float32)            # (TQ, TK) f32
            s = jnp.where(causal, s, -1e30)
            m_prev = m_ref[h]                                  # (TQ, 1)
            m_new = jnp.maximum(m_prev, jnp.max(s, axis=-1, keepdims=True))
            alpha = jnp.exp(m_prev - m_new)
            p = jnp.exp(s - m_new)
            l_ref[h] = alpha * l_ref[h] + jnp.sum(p, axis=-1, keepdims=True)
            acc_ref[h] = alpha * acc_ref[h] + jnp.dot(
                p.astype(vh.dtype), vh, preferred_element_type=jnp.float32)
            m_ref[h] = m_new

    @pl.when(j == pl.num_programs(1) - 1)
    def _finalize():
        # normalize each head (EUP approx reciprocal), concat along lanes and
        # run the dense output projection as one 512-wide contraction.
        ctx = jnp.concatenate(
            [(acc_ref[h] * pl.reciprocal(l_ref[h], approx=True)
              ).astype(jnp.bfloat16) for h in range(NUM_HEADS)],
            axis=1)                                            # (TQ, Q_SIZE)
        o_ref[...] = jnp.dot(ctx, wd_ref[...],
                             preferred_element_type=jnp.float32
                             ).astype(o_ref.dtype)


# ----------------------------- RoPE coefficient tables -----------------------
def _build_rope_tables(position_ids):
    """cos / ta / tb of shape (T, ROPE_WIDTH).

    ta multiplies the lane+1 neighbour (non-zero only at even lanes of each
    head's rotary region, value -sin); tb multiplies the lane-1 neighbour
    (odd lanes, value +sin).  Pass-through lanes: cos=1, ta=tb=0.  The
    attention scale is folded into the q section."""
    T = position_ids.shape[0]
    pos = position_ids.astype(jnp.float32)
    inv_freq = 1.0 / (ROPE_BASE ** (
        jnp.arange(0, ROTARY_DIM, 2, dtype=jnp.float32) / ROTARY_DIM))
    angle = pos[:, None] * inv_freq[None, :]            # (T, ROTARY_DIM//2)
    cos = jnp.cos(angle)
    sin = jnp.sin(angle)

    cos_pairs = jnp.repeat(cos, 2, axis=1)                          # (T, 64)
    sa_pairs = jnp.stack([-sin, jnp.zeros_like(sin)], axis=2
                         ).reshape(T, ROTARY_DIM)                   # [-s,0,..]
    sb_pairs = jnp.stack([jnp.zeros_like(sin), sin], axis=2
                         ).reshape(T, ROTARY_DIM)                   # [0,+s,..]
    ones_pad = jnp.ones((T, HEAD_DIM - ROTARY_DIM), jnp.float32)
    zero_pad = jnp.zeros((T, HEAD_DIM - ROTARY_DIM), jnp.float32)
    head_cos = jnp.concatenate([cos_pairs, ones_pad], axis=1)       # (T, 128)
    head_sa = jnp.concatenate([sa_pairs, zero_pad], axis=1)
    head_sb = jnp.concatenate([sb_pairs, zero_pad], axis=1)

    def full(head_tab):
        return jnp.concatenate(
            [jnp.tile(head_tab, (1, NUM_HEADS)) * SCALE,     # q (scale folded)
             jnp.tile(head_tab, (1, NUM_KV_HEADS))],         # k
            axis=1)                                          # (T, ROPE_WIDTH)

    return full(head_cos), full(head_sa), full(head_sb)


# ----------------------------- wrapper ----------------------------------------
def glm_attention(hidden_states, position_ids, w_qkv, b_qkv, w_dense, *,
                  roll_is_jnp=True):
    T = hidden_states.shape[0]
    assert T % TQ == 0 and T % TK == 0

    cos_t, sa_t, sb_t = _build_rope_tables(position_ids)
    # pltpu.roll direction is detected at startup; swap the neighbour tables
    # if the hardware rotate uses the opposite convention to jnp.roll.
    ta, tb = (sa_t, sb_t) if roll_is_jnp else (sb_t, sa_t)

    x = hidden_states.astype(jnp.bfloat16)
    wq = w_qkv.astype(jnp.bfloat16)
    bq = b_qkv.reshape(1, QKV_OUT).astype(jnp.float32)
    wd = w_dense.astype(jnp.bfloat16)

    # --- kernel 1: fused QKV projection + RoPE --------------------------------
    qkv = pl.pallas_call(
        _qkv_rope_kernel,
        out_shape=jax.ShapeDtypeStruct((T, QKV_OUT), jnp.bfloat16),
        grid_spec=pltpu.PrefetchScalarGridSpec(
            num_scalar_prefetch=0,
            grid=(T // TQ,),
            in_specs=[
                pl.BlockSpec((TQ, HIDDEN), lambda i: (i, 0)),
                pl.BlockSpec((HIDDEN, QKV_OUT), lambda i: (0, 0)),
                pl.BlockSpec((1, QKV_OUT), lambda i: (0, 0)),
                pl.BlockSpec((TQ, ROPE_WIDTH), lambda i: (i, 0)),
                pl.BlockSpec((TQ, ROPE_WIDTH), lambda i: (i, 0)),
                pl.BlockSpec((TQ, ROPE_WIDTH), lambda i: (i, 0)),
            ],
            out_specs=pl.BlockSpec((TQ, QKV_OUT), lambda i: (i, 0)),
        ),
        compiler_params=pltpu.CompilerParams(
            dimension_semantics=("parallel",)),
        cost_estimate=pl.CostEstimate(
            flops=2 * T * HIDDEN * QKV_OUT + 6 * T * ROPE_WIDTH,
            transcendentals=0,
            bytes_accessed=(T * HIDDEN * 2 + HIDDEN * QKV_OUT * 2
                            + 3 * T * ROPE_WIDTH * 4 + T * QKV_OUT * 2)),
    )(x, wq, bq, cos_t, ta, tb)

    # --- kernel 2: flash causal MQA + output dense -----------------------------
    # qkv passed three times; each spec windows a different lane-aligned section
    # ([0:512]=q, [512:768]=k, [768:1024]=v) so no HBM slicing copies are made.
    out = pl.pallas_call(
        _mqa_flash_dense_kernel,
        out_shape=jax.ShapeDtypeStruct((T, HIDDEN), jnp.bfloat16),
        grid_spec=pltpu.PrefetchScalarGridSpec(
            num_scalar_prefetch=0,
            grid=(T // TQ, T // TK),
            in_specs=[
                pl.BlockSpec((TQ, Q_SIZE), lambda i, j: (i, 0)),
                pl.BlockSpec((TK, KV_SIZE),
                             lambda i, j: (j, Q_SIZE // KV_SIZE)),
                pl.BlockSpec((TK, KV_SIZE),
                             lambda i, j: (j, Q_SIZE // KV_SIZE + 1)),
                pl.BlockSpec((Q_SIZE, HIDDEN), lambda i, j: (0, 0)),
            ],
            out_specs=pl.BlockSpec((TQ, HIDDEN), lambda i, j: (i, 0)),
            scratch_shapes=[
                pltpu.VMEM((NUM_HEADS, TQ, 1), jnp.float32),        # m
                pltpu.VMEM((NUM_HEADS, TQ, 1), jnp.float32),        # l
                pltpu.VMEM((NUM_HEADS, TQ, HEAD_DIM), jnp.float32),  # acc
            ],
        ),
        compiler_params=pltpu.CompilerParams(
            dimension_semantics=("parallel", "arbitrary")),
        cost_estimate=pl.CostEstimate(
            flops=4 * T * T * NUM_HEADS * HEAD_DIM + 2 * T * Q_SIZE * HIDDEN,
            transcendentals=NUM_HEADS * T * T,
            bytes_accessed=(T * QKV_OUT * 2 + Q_SIZE * HIDDEN * 2
                            + T * HIDDEN * 2)),
    )(qkv, qkv, qkv, wd)

    return out


# ----------------------------- pltpu.roll convention probe -------------------
def _detect_roll_convention():
    """True iff pltpu.roll matches jnp.roll semantics (out[i] = x[i - shift])."""
    def probe(x_ref, o_ref):
        o_ref[...] = pltpu.roll(x_ref[...], 1, axis=1)
    x = jax.lax.broadcasted_iota(jnp.float32, (8, LANE), 1)
    y = jax.jit(pl.pallas_call(
        probe, out_shape=jax.ShapeDtypeStruct((8, LANE), jnp.float32)))(x)
    return bool(y[0, 1] == 0.0)


# ----------------------------- pure-JAX reference -----------------------------
def _rotate_interleaved(x, positions):
    inv_freq = 1.0 / (ROPE_BASE ** (
        jnp.arange(0, ROTARY_DIM, 2, dtype=jnp.float32) / ROTARY_DIM))
    angle = positions.astype(jnp.float32)[:, None] * inv_freq[None, :]
    cos = jnp.cos(angle)[:, None, :]
    sin = jnp.sin(angle)[:, None, :]
    x_rot, x_pass = x[..., :ROTARY_DIM], x[..., ROTARY_DIM:]
    x1, x2 = x_rot[..., 0::2], x_rot[..., 1::2]
    o1 = x1 * cos - x2 * sin
    o2 = x2 * cos + x1 * sin
    rot = jnp.stack([o1, o2], axis=-1).reshape(x_rot.shape)
    return jnp.concatenate([rot, x_pass], axis=-1)


def reference_glm_attention(hidden_states, position_ids, w_qkv, b_qkv, w_dense):
    T = hidden_states.shape[0]
    f32 = jnp.float32
    x = hidden_states.astype(jnp.bfloat16).astype(f32)
    wq = w_qkv.astype(jnp.bfloat16).astype(f32)
    wd = w_dense.astype(jnp.bfloat16).astype(f32)
    qkv = x @ wq + b_qkv[None, :].astype(f32)
    q = qkv[:, :Q_SIZE].reshape(T, NUM_HEADS, HEAD_DIM)
    k = qkv[:, Q_SIZE:Q_SIZE + KV_SIZE].reshape(T, NUM_KV_HEADS, HEAD_DIM)
    v = qkv[:, Q_SIZE + KV_SIZE:].reshape(T, NUM_KV_HEADS, HEAD_DIM)
    q = _rotate_interleaved(q, position_ids)
    k = _rotate_interleaved(k, position_ids)
    # match the kernel's bf16 storage of the rotated qkv
    q = q.astype(jnp.bfloat16).astype(f32)
    k = k.astype(jnp.bfloat16).astype(f32)
    v = v.astype(jnp.bfloat16).astype(f32)
    k = jnp.repeat(k, KV_REP, axis=1)
    v = jnp.repeat(v, KV_REP, axis=1)
    s = jnp.einsum("tnd,snd->nts", q, k) * SCALE
    mask = jnp.arange(T)[None, :] <= jnp.arange(T)[:, None]
    s = jnp.where(mask[None], s, -1e30)
    p = jax.nn.softmax(s, axis=-1)
    ctx = jnp.einsum("nts,snd->tnd", p, v).reshape(T, Q_SIZE)
    return ctx @ wd


# ----------------------------- main -------------------------------------------
if __name__ == "__main__":
    roll_jnp = _detect_roll_convention()

    key = jax.random.PRNGKey(0)
    k1, k2, k3, k4 = jax.random.split(key, 4)
    T = SEQ_LEN
    hidden_states = jax.random.normal(k1, (T, HIDDEN), jnp.float32)
    w_qkv = 0.02 * jax.random.normal(k2, (HIDDEN, QKV_OUT), jnp.float32)
    b_qkv = 0.02 * jax.random.normal(k3, (QKV_OUT,), jnp.float32)  # add_qkv_bias
    w_dense = 0.02 * jax.random.normal(k4, (Q_SIZE, HIDDEN), jnp.float32)
    position_ids = jnp.arange(T, dtype=jnp.int32)

    fwd = jax.jit(functools.partial(glm_attention, roll_is_jnp=roll_jnp))
    out = fwd(hidden_states, position_ids, w_qkv, b_qkv, w_dense)
    jax.block_until_ready(out)

    assert out.shape == (T, HIDDEN)
    assert bool(jnp.all(jnp.isfinite(out)))

    ref = reference_glm_attention(hidden_states, position_ids,
                                  w_qkv, b_qkv, w_dense)
    err = float(jnp.max(jnp.abs(out.astype(jnp.float32) - ref)))
    assert err < 5e-2, f"kernel vs reference mismatch: max abs err {err}"

    print("KERNEL_OK")
</pallas_src>

<mosaic_0001>
module attributes {stable_mosaic.version = 11 : i64} {
  func.func @probe(%arg0: memref<8x128xf32, #tpu.memory_space<vmem>>, %arg1: memref<8x128xf32, #tpu.memory_space<vmem>>) attributes {dimension_semantics = [], scalar_prefetch = 0 : i64, scratch_operands = 0 : i64, tpu.core_type = #tpu.core_type<tc>} {
    %c0 = arith.constant 0 : index
    %c0_0 = arith.constant 0 : index
    %0 = vector.load %arg0[%c0, %c0_0] : memref<8x128xf32, #tpu.memory_space<vmem>>, vector<8x128xf32>
    %c1_i32 = arith.constant 1 : i32
    %1 = tpu.dynamic_rotate %0 by %c1_i32 dim 1 : vector<8x128xf32>, i32 -> vector<8x128xf32>
    %c0_1 = arith.constant 0 : index
    %c0_2 = arith.constant 0 : index
    %2 = vector.load %arg1[%c0_1, %c0_2] : memref<8x128xf32, #tpu.memory_space<vmem>>, vector<8x128xf32>
    tpu.vector_store %arg1[%c0_1, %c0_2], %1 {strides = array<i32>} : memref<8x128xf32, #tpu.memory_space<vmem>>, vector<8x128xf32>,
    return
  }
}

</mosaic_0001>

<bundles_post_ra>
// kernel: tpu_custom_call.1
= control target key start
LH: loop header
LB: loop body
LE: loop exit
PB: predicated region body
PF: predicated region fallthrough
CT: control target
= control target key end

     0   :  { %6 = vsyncpa [#allocation3], 0  ;;  %s128_s0 = inlined_call_operand.hbm [shape: f32[8,128], index: 0, kind: input, shape index: {}]   ;;  %s129_s1 = inlined_call_operand.hbm [shape: f32[8,128], index: 1, kind: output, shape index: {}]  }
   0x1   :  { %7 = vsyncpa [#allocation4], 0  ;;  %s91_s6 = smov [#allocation2]   ;;  %s43_s10 = scalar_lea.hbm %s128_s0, 128 }
   0x2   :  { %s14_s7 = sshll.u32 %s91_s6, 4  ;;  %p44_p0 = scmp.ne.s32.totalorder %s128_s0, %s43_s10  ;;  %s15_s7 = int_to_ptr.vmem [resolvable:$true] %s14_s7 }
   0x3   :  { %p47_p1 = scmp.lt.u32.totalorder %s43_s10, %s128_s0 }
   0x5   :  { %p49_p2 = pnand %p47_p1, %p44_p0 }
   0x7   :  { %52 = shalt.err (!%p49_p2)
}
   0x8   :  { %s53_s15 = scalar_lea.vmem %s15_s7, 128  ;;  %p58_p4 = scmp.lt.s32.totalorder %s15_s7, %s15_s7 }
   0x9   :  { %p54_p3 = scmp.ne.s32.totalorder %s15_s7, %s53_s15  ;;  %p59_p5 = scmp.lt.s32.totalorder %s53_s15, %s53_s15 }
   0xb   :  { %p60_p6 = por %p59_p5, %p58_p4 }
   0xd   :  { %p61_p7 = pnand %p60_p6, %p54_p3 }
   0xf   :  { %64 = shalt.err (!%p61_p7)
}
  0x10   :  { %17 = dma.hbm_to_vmem [thread:$0]  %s128_s0, 128, %s15_s7, [#allocation3]  }
  0x11   :  { %87 = dma.done.wait [#allocation3], 128  }
  0x12   :  { %88 = vsyncadd [#allocation3], 4294967168  ;;  %v21_v0 = vld [vmem:[#allocation2] sm:$0xff]  ;;  %s92_s18 = smov 1   ;;  %s93_s19 = smov [#allocation5]  }
  0x13   :  { %22 = vrot.lane.b32.xlu0 %v21_v0, %s92_s18  ;;  %s31_s20 = sshll.u32 %s93_s19, 4  ;;  %s32_s20 = int_to_ptr.vmem [resolvable:$true] %s31_s20 }
  0x14   :  { %s65_s21 = scalar_lea.vmem %s32_s20, 128  ;;  %p70_p9 = scmp.lt.s32.totalorder %s32_s20, %s32_s20 }
  0x15   :  { %p66_p8 = scmp.ne.s32.totalorder %s32_s20, %s65_s21  ;;  %p71_p10 = scmp.lt.s32.totalorder %s65_s21, %s65_s21 }
  0x17   :  { %p72_p11 = por %p71_p10, %p70_p9 }
  0x19   :  { %p73_p12 = pnand %p72_p11, %p66_p8 }
  0x85   :  { %v23_v1 = vpop.permute.xlu0 %22 }
  0x86   :  { %24 = vst [vmem:[#allocation5] sm:$0xff] %v23_v1 }
  0x87   :  { %76 = shalt.err (!%p73_p12)
}
  0x88   :  { %s77_s0 = scalar_lea.hbm %s129_s1, 128 }
  0x89   :  { %p78_p13 = scmp.ne.s32.totalorder %s129_s1, %s77_s0  ;;  %p81_p0 = scmp.lt.u32.totalorder %s77_s0, %s129_s1 }
  0x8b   :  { %p83_p1 = pnand %p81_p0, %p78_p13 }
  0x8d   :  { %86 = shalt.err (!%p83_p1)
}
  0x8e   :  { %34 = dma.vmem_to_hbm [thread:$0]  %s32_s20, 128, %s129_s1, [#allocation4]  }
  0x8f   :  { %89 = dma.done.wait [#allocation4], 128  }
  0x90   :  { %90 = vsyncadd [#allocation4], 4294967168 }
  0x91   :  { %38 = vsyncpa [#allocation3], 1 }
  0x92   :  { %39 = vsyncpa [#allocation4], 1 }

</bundles_post_ra>
